<compile_context>
chip_gen: v7x
topology: tpu7x:2x2x1
jax: 0.10.0
libtpu: 0.0.40
codegen_flags: <defaults>
</compile_context>

<pallas_src>
import numpy as np
import jax
import jax.numpy as jnp
from jax import lax
from jax.experimental import pallas as pl
from jax.experimental.pallas import tpu as pltpu

EMBEDDING_DIM = 100
M = 50
NUM_CHUNK = EMBEDDING_DIM // M        # = 2, matches self.num_chunk in the module
D_PAD = 128                           # embedding dim padded to one full lane row
CROWS = 8                             # constant-matrix rows (>= 2*NUM_CHUNK, sublane aligned)
COS_EPS = 1e-8                        # torch.nn.CosineSimilarity eps
L1_EPS = 1e-12                        # torch F.normalize(p=1) eps
_EBUF_BUDGET = 8 << 20                # cap (bytes) for the (S, TB, 128) gather scratch


def _round_up(x, m):
    return ((x + m - 1) // m) * m


def _make_kernel(S, TB, B_pad):
    def kernel(idx_ref,      # SMEM (S*B_pad,) int32  scalar-prefetched word ids, s-major
               cew_ref,      # VMEM (CROWS, D_PAD)    rows [0,NC)=u_c masked, [NC,2NC)=w_c masked
               cq_ref,       # VMEM (CROWS, D_PAD)    rows [0,NC)=chunk_mask_c * ||u_c||^2
               table_ref,    # HBM  (V, D_PAD)        embedding table (memory_space=pl.ANY)
               o_ref,        # VMEM (1, 1, TB)        per-sentence logits, lane-dense row
               ebuf,         # VMEM (S, TB, D_PAD)    gathered embeddings
               sem):         # DMA  (S,)              one semaphore per s-slab
        b = pl.program_id(0)
        base = b * TB

        # ---- fused embedding gather: issue every 512 B row DMA up front, slab-major ----
        @pl.loop(0, S)
        def _issue_slab(s):
            row = s * B_pad + base                 # ids are s-major: one add per token below
            @pl.loop(0, TB)
            def _issue_tok(t):
                wid = idx_ref[row + t]
                pltpu.make_async_copy(table_ref.at[wid], ebuf.at[s, t], sem.at[s]).start()

        cew = cew_ref[...]                          # (CROWS, D_PAD)
        cq = cq_ref[...]                            # (CROWS, D_PAD)
        dimn = (((1,), (1,)), ((), ()))             # contract D (minor dim of both operands)

        den = jnp.zeros((NUM_CHUNK, TB), jnp.float32)   # sum_s exp(cos_c)      (1 vreg)
        num = jnp.zeros((NUM_CHUNK, TB), jnp.float32)   # sum_s exp(cos_c)*e.w_c (1 vreg)
        for s in range(S):                          # S is small and static -> unrolled
            # Wait for exactly this slab's TB row copies right before it is read, so
            # compute on slab s overlaps the DMAs of the later slabs.
            pltpu.make_async_copy(ebuf.at[s], ebuf.at[s], sem.at[s]).wait()
            e = ebuf[s]                                              # (TB, D_PAD)
            r = lax.dot_general(cew, e, dimn,
                                preferred_element_type=jnp.float32)  # (CROWS, TB) on the MXU
            rq = lax.dot_general(cq, e * e, dimn,
                                 preferred_element_type=jnp.float32)
            d = r[0:NUM_CHUNK, :]                                    # e_chunk . u_c
            ew = r[NUM_CHUNK:2 * NUM_CHUNK, :]                       # e_chunk . w_c
            qn = rq[0:NUM_CHUNK, :]                                  # |e_chunk|^2 * |u_c|^2
            # cosine sim: d / max(|e||u|, eps) == d * rsqrt(max(|e|^2|u|^2, eps^2))
            cos = d * lax.rsqrt(jnp.maximum(qn, COS_EPS * COS_EPS))
            a = jnp.exp(cos)                                         # lane-dense EUP call
            den = den + a
            num = num + a * ew

        # Fold F.normalize(p=1) and the final linear layer: sum_c num_c / max(den_c, eps).
        ratio = num * pl.reciprocal(jnp.maximum(den, L1_EPS), approx=False)
        total = ratio[0:1, :]
        for c in range(1, NUM_CHUNK):
            total = total + ratio[c:c + 1, :]
        o_ref[0] = total                                             # one (1, TB) row store

    return kernel


def binary_classifier_forward(batch_word_idxs, embed_table, attend_u, weights, *, max_tb=256):
    """Pallas implementation of BinaryClassifier.forward (float32)."""
    B, S = batch_word_idxs.shape
    V, D = embed_table.shape
    assert D == EMBEDDING_DIM
    assert attend_u.shape == (NUM_CHUNK, M)
    assert 2 * NUM_CHUNK <= CROWS

    f32 = jnp.float32

    # TB sentences per grid step:
    #  - >= 2 grid blocks whenever B > 8 so both v7x TensorCores get work,
    #  - up to max_tb rows to amortize the ~0.35 us/step grid overhead (v5e/v6e),
    #  - capped so the (S, TB, 128) f32 gather scratch stays well under scoped VMEM.
    tb_vmem_cap = max(8, ((_EBUF_BUDGET // (S * D_PAD * 4)) // 8) * 8)
    TB = max(8, min(max_tb, _round_up(pl.cdiv(B, 2), 8), tb_vmem_cap))
    B_pad = _round_up(B, TB)
    num_blocks = B_pad // TB

    # Embedding table: pad each row to a full 128-lane vreg row; it stays in HBM.
    table_pad = jnp.pad(embed_table.astype(f32), ((0, 0), (0, D_PAD - D)))

    # Word ids: pad the batch (pad id 0 is a valid row; padded logits are sliced off)
    # and store them s-major so the issue loop needs one scalar add per token.
    # NOTE: scalar prefetch places all S*B_pad ids in SMEM; fine for assignment-scale
    # batches (SMEM ~1 MiB), block the ids per grid step if B*S ever gets huge.
    idx = jnp.pad(batch_word_idxs.astype(jnp.int32), ((0, B_pad - B), (0, 0)))
    idx_flat = jnp.transpose(idx).reshape(-1)          # (S * B_pad,), pos = s*B_pad + sentence

    # Per-chunk constants packed as rows of two (CROWS, 128) matrices so the whole
    # contraction is two small MXU matmuls per slab (replaces 6 XLU lane reductions).
    u_f = attend_u.astype(f32)
    w_flat = weights.reshape(-1).astype(f32)
    c_ew = jnp.zeros((CROWS, D_PAD), f32)
    c_q = jnp.zeros((CROWS, D_PAD), f32)
    for c in range(NUM_CHUNK):
        lo = c * M
        c_ew = c_ew.at[c, lo:lo + M].set(u_f[c])                       # rows 0..NC-1 : u_c
        c_ew = c_ew.at[NUM_CHUNK + c, lo:lo + M].set(w_flat[lo:lo + M])  # rows NC..2NC-1: w_c
        c_q = c_q.at[c, lo:lo + M].set(jnp.sum(u_f[c] * u_f[c]))       # chunk_mask * ||u_c||^2

    kernel = _make_kernel(S, TB, B_pad)
    out = pl.pallas_call(
        kernel,
        out_shape=jax.ShapeDtypeStruct((num_blocks, 1, TB), f32),
        grid_spec=pltpu.PrefetchScalarGridSpec(
            num_scalar_prefetch=1,
            grid=(num_blocks,),
            in_specs=[
                pl.BlockSpec((CROWS, D_PAD), lambda b, _idx: (0, 0)),
                pl.BlockSpec((CROWS, D_PAD), lambda b, _idx: (0, 0)),
                pl.BlockSpec(memory_space=pl.ANY),        # embedding table stays in HBM
            ],
            out_specs=pl.BlockSpec((1, 1, TB), lambda b, _idx: (b, 0, 0)),
            scratch_shapes=[
                pltpu.VMEM((S, TB, D_PAD), f32),
                pltpu.SemaphoreType.DMA((S,)),
            ],
        ),
        compiler_params=pltpu.CompilerParams(dimension_semantics=("parallel",)),
    )(idx_flat, c_ew, c_q, table_pad)
    return out.reshape(-1)[:B].reshape(B, 1)              # (B, 1)


def ref_forward(batch_word_idxs, embed_table, attend_u, weights):
    """Pure-JAX reference mirroring the PyTorch forward (float32)."""
    emb = embed_table[batch_word_idxs].astype(jnp.float32)   # (B, S, D)
    att = attend_u.astype(jnp.float32)
    w = weights.astype(jnp.float32)

    def per_sentence(e):
        hs = []
        for c in range(NUM_CHUNK):
            ec = e[:, c * M:(c + 1) * M]                      # (S, M)
            uc = att[c]                                       # (M,)
            cos = (ec @ uc) / jnp.maximum(
                jnp.linalg.norm(ec, axis=1) * jnp.linalg.norm(uc), COS_EPS)
            a = jnp.exp(cos)
            na = a / jnp.maximum(a.sum(), L1_EPS)
            hs.append((ec * na[:, None]).sum(axis=0))
        return jnp.concatenate(hs)

    hiddens = jax.vmap(per_sentence)(emb)                     # (B, D)
    return hiddens @ w                                        # (B, 1)


if __name__ == "__main__":
    corpus_size = 64
    B, S = 2, 8

    # Deterministic parameter init matching BinaryClassifier.__init__
    # (np.random.seed(100) uniform embeddings, ones for weights / attend_u).
    np.random.seed(100)
    embed_table = jnp.asarray(
        np.random.uniform(-1.0, 1.0, (corpus_size, EMBEDDING_DIM)), dtype=jnp.float32)
    weights = jnp.ones((EMBEDDING_DIM, 1), dtype=jnp.float32)
    attend_u = jnp.ones((NUM_CHUNK, M), dtype=jnp.float32)

    # Deterministic example input: batch of word-index sequences.
    key = jax.random.PRNGKey(0)
    batch_word_idxs = jax.random.randint(key, (B, S), 0, corpus_size, dtype=jnp.int32)

    out = binary_classifier_forward(batch_word_idxs, embed_table, attend_u, weights)
    out = jax.block_until_ready(out)
    ref = ref_forward(batch_word_idxs, embed_table, attend_u, weights)
    assert out.shape == (B, 1)
    np.testing.assert_allclose(np.asarray(out), np.asarray(ref), rtol=1e-4, atol=1e-4)

    # Also exercise the multi-block + padded-tail path (num_blocks = 2, TB = 16).
    B2 = 20
    idx2 = jax.random.randint(jax.random.PRNGKey(1), (B2, S), 0, corpus_size, dtype=jnp.int32)
    out2 = jax.block_until_ready(
        binary_classifier_forward(idx2, embed_table, attend_u, weights))
    ref2 = ref_forward(idx2, embed_table, attend_u, weights)
    assert out2.shape == (B2, 1)
    np.testing.assert_allclose(np.asarray(out2), np.asarray(ref2), rtol=1e-4, atol=1e-4)

    print("KERNEL_OK")
</pallas_src>

<mosaic_0001>
module attributes {stable_mosaic.version = 11 : i64} {
  func.func @kernel(%arg0: i32, %arg1: memref<64xi32, #tpu.memory_space<smem>>, %arg2: memref<8x128xf32, #tpu.memory_space<vmem>>, %arg3: memref<8x128xf32, #tpu.memory_space<vmem>>, %arg4: memref<64x128xf32, #tpu.memory_space<any>>, %arg5: memref<1x1x8xf32, #tpu.memory_space<vmem>>, %arg6: memref<8x8x128xf32, #tpu.memory_space<vmem>>, %arg7: memref<8x!tpu.dma_semaphore, #tpu.memory_space<semaphore_mem>>) attributes {dimension_semantics = [#tpu.dimension_semantics<parallel>], iteration_bounds = array<i64: 1>, scalar_prefetch = 1 : i64, scratch_operands = 2 : i64, tpu.core_type = #tpu.core_type<tc>, window_params = [{pipeline_mode = #tpu.pipeline_mode<synchronous>, transform_indices = @transform_0, window_bounds = array<i64: 8, 128>}, {pipeline_mode = #tpu.pipeline_mode<synchronous>, transform_indices = @transform_1, window_bounds = array<i64: 8, 128>}, {}, {transform_indices = @transform_3, window_bounds = array<i64: 1, 1, 8>}]} {
    %c8_i32 = arith.constant 8 : i32
    %0 = arith.muli %arg0, %c8_i32 : i32
    %c0_i32 = arith.constant 0 : i32
    %c8_i32_0 = arith.constant 8 : i32
    %1 = arith.addi %c0_i32, %c8_i32_0 : i32
    %c1_i32 = arith.constant 1 : i32
    scf.for %arg8 = %c0_i32 to %1 step %c1_i32  : i32 {
      %c1_i32_101 = arith.constant 1 : i32
      %192 = arith.muli %arg8, %c1_i32_101 : i32
      %c0_i32_102 = arith.constant 0 : i32
      %193 = arith.addi %c0_i32_102, %192 : i32
      %c8_i32_103 = arith.constant 8 : i32
      %194 = arith.muli %193, %c8_i32_103 : i32
      %195 = arith.addi %194, %0 : i32
      %c0_i32_104 = arith.constant 0 : i32
      %c8_i32_105 = arith.constant 8 : i32
      %196 = arith.addi %c0_i32_104, %c8_i32_105 : i32
      %c1_i32_106 = arith.constant 1 : i32
      scf.for %arg9 = %c0_i32_104 to %196 step %c1_i32_106  : i32 {
        %c1_i32_108 = arith.constant 1 : i32
        %197 = arith.muli %arg9, %c1_i32_108 : i32
        %c0_i32_109 = arith.constant 0 : i32
        %198 = arith.addi %c0_i32_109, %197 : i32
        %199 = arith.addi %195, %198 : i32
        %200 = arith.index_cast %199 : i32 to index
        %201 = memref.load %arg1[%200] : memref<64xi32, #tpu.memory_space<smem>>
        %c0_i32_110 = arith.constant 0 : i32
        %202 = tpu.memref_slice %arg4[%201, %c0_i32_110] : memref<64x128xf32, #tpu.memory_space<any>> -> memref<1x128xf32, #tpu.memory_space<any>>
        %203 = tpu.memref_squeeze %202 : memref<1x128xf32, #tpu.memory_space<any>> -> memref<128xf32, #tpu.memory_space<any>>
        %c0_i32_111 = arith.constant 0 : i32
        %204 = tpu.memref_slice %arg6[%193, %198, %c0_i32_111] : memref<8x8x128xf32, #tpu.memory_space<vmem>> -> memref<1x1x128xf32, #tpu.memory_space<vmem>>
        %205 = tpu.memref_squeeze %204 : memref<1x1x128xf32, #tpu.memory_space<vmem>> -> memref<128xf32, #tpu.memory_space<vmem>>
        %206 = tpu.memref_slice %arg7[%193] : memref<8x!tpu.dma_semaphore, #tpu.memory_space<semaphore_mem>> -> memref<1x!tpu.dma_semaphore, #tpu.memory_space<semaphore_mem>>
        %207 = tpu.memref_squeeze %206 : memref<1x!tpu.dma_semaphore, #tpu.memory_space<semaphore_mem>> -> memref<!tpu.dma_semaphore, #tpu.memory_space<semaphore_mem>>
        tpu.enqueue_dma source(%203 : memref<128xf32, #tpu.memory_space<any>>) target(%205 : memref<128xf32, #tpu.memory_space<vmem>>) target_semaphore(%207 : memref<!tpu.dma_semaphore, #tpu.memory_space<semaphore_mem>>)
      }
      %c8_i32_107 = arith.constant 8 : i32
    }
    %c8_i32_1 = arith.constant 8 : i32
    %c0 = arith.constant 0 : index
    %c0_2 = arith.constant 0 : index
    %2 = vector.load %arg2[%c0, %c0_2] : memref<8x128xf32, #tpu.memory_space<vmem>>, vector<8x128xf32>
    %c0_3 = arith.constant 0 : index
    %c0_4 = arith.constant 0 : index
    %3 = vector.load %arg3[%c0_3, %c0_4] : memref<8x128xf32, #tpu.memory_space<vmem>>, vector<8x128xf32>
    %cst = arith.constant 0.000000e+00 : f32
    %4 = vector.broadcast %cst : f32 to vector<2x8xf32>
    %cst_5 = arith.constant 0.000000e+00 : f32
    %5 = vector.broadcast %cst_5 : f32 to vector<2x8xf32>
    %c0_i32_6 = arith.constant 0 : i32
    %c0_i32_7 = arith.constant 0 : i32
    %c0_i32_8 = arith.constant 0 : i32
    %c0_i32_9 = arith.constant 0 : i32
    %c0_i32_10 = arith.constant 0 : i32
    %6 = tpu.memref_slice %arg6[%c0_i32_6, %c0_i32_9, %c0_i32_10] : memref<8x8x128xf32, #tpu.memory_space<vmem>> -> memref<1x8x128xf32, #tpu.memory_space<vmem>>
    %7 = tpu.memref_squeeze %6 : memref<1x8x128xf32, #tpu.memory_space<vmem>> -> memref<8x128xf32, #tpu.memory_space<vmem>>
    %c0_i32_11 = arith.constant 0 : i32
    %c0_i32_12 = arith.constant 0 : i32
    %8 = tpu.memref_slice %arg6[%c0_i32_7, %c0_i32_11, %c0_i32_12] : memref<8x8x128xf32, #tpu.memory_space<vmem>> -> memref<1x8x128xf32, #tpu.memory_space<vmem>>
    %9 = tpu.memref_squeeze %8 : memref<1x8x128xf32, #tpu.memory_space<vmem>> -> memref<8x128xf32, #tpu.memory_space<vmem>>
    %10 = tpu.memref_slice %arg7[%c0_i32_8] : memref<8x!tpu.dma_semaphore, #tpu.memory_space<semaphore_mem>> -> memref<1x!tpu.dma_semaphore, #tpu.memory_space<semaphore_mem>>
    %11 = tpu.memref_squeeze %10 : memref<1x!tpu.dma_semaphore, #tpu.memory_space<semaphore_mem>> -> memref<!tpu.dma_semaphore, #tpu.memory_space<semaphore_mem>>
    tpu.wait_dma2 semaphore(%11 : memref<!tpu.dma_semaphore, #tpu.memory_space<semaphore_mem>>) src(%7 : memref<8x128xf32, #tpu.memory_space<vmem>>) dst(%9 : memref<8x128xf32, #tpu.memory_space<vmem>>)
    %c0_13 = arith.constant 0 : index
    %c0_14 = arith.constant 0 : index
    %c0_15 = arith.constant 0 : index
    %12 = vector.load %arg6[%c0_13, %c0_14, %c0_15] : memref<8x8x128xf32, #tpu.memory_space<vmem>>, vector<1x8x128xf32>
    %13 = vector.shape_cast %12 : vector<1x8x128xf32> to vector<8x128xf32>
    %cst_16 = arith.constant dense<0.000000e+00> : vector<8x8xf32>
    %14 = tpu.matmul %2, %13, %cst_16 {dimension_numbers = #tpu.dot_dimension_numbers<[1], [1], [0], [0], [0, 0, 1, 0], [], []>} : vector<8x128xf32>, vector<8x128xf32>, vector<8x8xf32> -> vector<8x8xf32>
    %15 = arith.mulf %13, %13 : vector<8x128xf32>
    %cst_17 = arith.constant dense<0.000000e+00> : vector<8x8xf32>
    %16 = tpu.matmul %3, %15, %cst_17 {dimension_numbers = #tpu.dot_dimension_numbers<[1], [1], [0], [0], [0, 0, 1, 0], [], []>} : vector<8x128xf32>, vector<8x128xf32>, vector<8x8xf32> -> vector<8x8xf32>
    %17 = vector.extract_strided_slice %14 {offsets = [0, 0], sizes = [2, 8], strides = [1, 1]} : vector<8x8xf32> to vector<2x8xf32>
    %18 = vector.extract_strided_slice %14 {offsets = [2, 0], sizes = [2, 8], strides = [1, 1]} : vector<8x8xf32> to vector<2x8xf32>
    %19 = vector.extract_strided_slice %16 {offsets = [0, 0], sizes = [2, 8], strides = [1, 1]} : vector<8x8xf32> to vector<2x8xf32>
    %cst_18 = arith.constant 1.000000e-16 : f32
    %20 = vector.broadcast %cst_18 : f32 to vector<2x8xf32>
    %21 = arith.maximumf %19, %20 : vector<2x8xf32>
    %22 = math.rsqrt %21 : vector<2x8xf32>
    %23 = arith.mulf %17, %22 : vector<2x8xf32>
    %24 = math.exp %23 : vector<2x8xf32>
    %25 = arith.addf %4, %24 : vector<2x8xf32>
    %26 = arith.mulf %24, %18 : vector<2x8xf32>
    %27 = arith.addf %5, %26 : vector<2x8xf32>
    %c1_i32_19 = arith.constant 1 : i32
    %c1_i32_20 = arith.constant 1 : i32
    %c1_i32_21 = arith.constant 1 : i32
    %c0_i32_22 = arith.constant 0 : i32
    %c0_i32_23 = arith.constant 0 : i32
    %28 = tpu.memref_slice %arg6[%c1_i32_19, %c0_i32_22, %c0_i32_23] : memref<8x8x128xf32, #tpu.memory_space<vmem>> -> memref<1x8x128xf32, #tpu.memory_space<vmem>>
    %29 = tpu.memref_squeeze %28 : memref<1x8x128xf32, #tpu.memory_space<vmem>> -> memref<8x128xf32, #tpu.memory_space<vmem>>
    %c0_i32_24 = arith.constant 0 : i32
    %c0_i32_25 = arith.constant 0 : i32
    %30 = tpu.memref_slice %arg6[%c1_i32_20, %c0_i32_24, %c0_i32_25] : memref<8x8x128xf32, #tpu.memory_space<vmem>> -> memref<1x8x128xf32, #tpu.memory_space<vmem>>
    %31 = tpu.memref_squeeze %30 : memref<1x8x128xf32, #tpu.memory_space<vmem>> -> memref<8x128xf32, #tpu.memory_space<vmem>>
    %32 = tpu.memref_slice %arg7[%c1_i32_21] : memref<8x!tpu.dma_semaphore, #tpu.memory_space<semaphore_mem>> -> memref<1x!tpu.dma_semaphore, #tpu.memory_space<semaphore_mem>>
    %33 = tpu.memref_squeeze %32 : memref<1x!tpu.dma_semaphore, #tpu.memory_space<semaphore_mem>> -> memref<!tpu.dma_semaphore, #tpu.memory_space<semaphore_mem>>
    tpu.wait_dma2 semaphore(%33 : memref<!tpu.dma_semaphore, #tpu.memory_space<semaphore_mem>>) src(%29 : memref<8x128xf32, #tpu.memory_space<vmem>>) dst(%31 : memref<8x128xf32, #tpu.memory_space<vmem>>)
    %c1 = arith.constant 1 : index
    %c0_26 = arith.constant 0 : index
    %c0_27 = arith.constant 0 : index
    %34 = vector.load %arg6[%c1, %c0_26, %c0_27] : memref<8x8x128xf32, #tpu.memory_space<vmem>>, vector<1x8x128xf32>
    %35 = vector.shape_cast %34 : vector<1x8x128xf32> to vector<8x128xf32>
    %cst_28 = arith.constant dense<0.000000e+00> : vector<8x8xf32>
    %36 = tpu.matmul %2, %35, %cst_28 {dimension_numbers = #tpu.dot_dimension_numbers<[1], [1], [0], [0], [0, 0, 1, 0], [], []>} : vector<8x128xf32>, vector<8x128xf32>, vector<8x8xf32> -> vector<8x8xf32>
    %37 = arith.mulf %35, %35 : vector<8x128xf32>
    %cst_29 = arith.constant dense<0.000000e+00> : vector<8x8xf32>
    %38 = tpu.matmul %3, %37, %cst_29 {dimension_numbers = #tpu.dot_dimension_numbers<[1], [1], [0], [0], [0, 0, 1, 0], [], []>} : vector<8x128xf32>, vector<8x128xf32>, vector<8x8xf32> -> vector<8x8xf32>
    %39 = vector.extract_strided_slice %36 {offsets = [0, 0], sizes = [2, 8], strides = [1, 1]} : vector<8x8xf32> to vector<2x8xf32>
    %40 = vector.extract_strided_slice %36 {offsets = [2, 0], sizes = [2, 8], strides = [1, 1]} : vector<8x8xf32> to vector<2x8xf32>
    %41 = vector.extract_strided_slice %38 {offsets = [0, 0], sizes = [2, 8], strides = [1, 1]} : vector<8x8xf32> to vector<2x8xf32>
    %cst_30 = arith.constant 1.000000e-16 : f32
    %42 = vector.broadcast %cst_30 : f32 to vector<2x8xf32>
    %43 = arith.maximumf %41, %42 : vector<2x8xf32>
    %44 = math.rsqrt %43 : vector<2x8xf32>
    %45 = arith.mulf %39, %44 : vector<2x8xf32>
    %46 = math.exp %45 : vector<2x8xf32>
    %47 = arith.addf %25, %46 : vector<2x8xf32>
    %48 = arith.mulf %46, %40 : vector<2x8xf32>
    %49 = arith.addf %27, %48 : vector<2x8xf32>
    %c2_i32 = arith.constant 2 : i32
    %c2_i32_31 = arith.constant 2 : i32
    %c2_i32_32 = arith.constant 2 : i32
    %c0_i32_33 = arith.constant 0 : i32
    %c0_i32_34 = arith.constant 0 : i32
    %50 = tpu.memref_slice %arg6[%c2_i32, %c0_i32_33, %c0_i32_34] : memref<8x8x128xf32, #tpu.memory_space<vmem>> -> memref<1x8x128xf32, #tpu.memory_space<vmem>>
    %51 = tpu.memref_squeeze %50 : memref<1x8x128xf32, #tpu.memory_space<vmem>> -> memref<8x128xf32, #tpu.memory_space<vmem>>
    %c0_i32_35 = arith.constant 0 : i32
    %c0_i32_36 = arith.constant 0 : i32
    %52 = tpu.memref_slice %arg6[%c2_i32_31, %c0_i32_35, %c0_i32_36] : memref<8x8x128xf32, #tpu.memory_space<vmem>> -> memref<1x8x128xf32, #tpu.memory_space<vmem>>
    %53 = tpu.memref_squeeze %52 : memref<1x8x128xf32, #tpu.memory_space<vmem>> -> memref<8x128xf32, #tpu.memory_space<vmem>>
    %54 = tpu.memref_slice %arg7[%c2_i32_32] : memref<8x!tpu.dma_semaphore, #tpu.memory_space<semaphore_mem>> -> memref<1x!tpu.dma_semaphore, #tpu.memory_space<semaphore_mem>>
    %55 = tpu.memref_squeeze %54 : memref<1x!tpu.dma_semaphore, #tpu.memory_space<semaphore_mem>> -> memref<!tpu.dma_semaphore, #tpu.memory_space<semaphore_mem>>
    tpu.wait_dma2 semaphore(%55 : memref<!tpu.dma_semaphore, #tpu.memory_space<semaphore_mem>>) src(%51 : memref<8x128xf32, #tpu.memory_space<vmem>>) dst(%53 : memref<8x128xf32, #tpu.memory_space<vmem>>)
    %c2 = arith.constant 2 : index
    %c0_37 = arith.constant 0 : index
    %c0_38 = arith.constant 0 : index
    %56 = vector.load %arg6[%c2, %c0_37, %c0_38] : memref<8x8x128xf32, #tpu.memory_space<vmem>>, vector<1x8x128xf32>
    %57 = vector.shape_cast %56 : vector<1x8x128xf32> to vector<8x128xf32>
    %cst_39 = arith.constant dense<0.000000e+00> : vector<8x8xf32>
    %58 = tpu.matmul %2, %57, %cst_39 {dimension_numbers = #tpu.dot_dimension_numbers<[1], [1], [0], [0], [0, 0, 1, 0], [], []>} : vector<8x128xf32>, vector<8x128xf32>, vector<8x8xf32> -> vector<8x8xf32>
    %59 = arith.mulf %57, %57 : vector<8x128xf32>
    %cst_40 = arith.constant dense<0.000000e+00> : vector<8x8xf32>
    %60 = tpu.matmul %3, %59, %cst_40 {dimension_numbers = #tpu.dot_dimension_numbers<[1], [1], [0], [0], [0, 0, 1, 0], [], []>} : vector<8x128xf32>, vector<8x128xf32>, vector<8x8xf32> -> vector<8x8xf32>
    %61 = vector.extract_strided_slice %58 {offsets = [0, 0], sizes = [2, 8], strides = [1, 1]} : vector<8x8xf32> to vector<2x8xf32>
    %62 = vector.extract_strided_slice %58 {offsets = [2, 0], sizes = [2, 8], strides = [1, 1]} : vector<8x8xf32> to vector<2x8xf32>
    %63 = vector.extract_strided_slice %60 {offsets = [0, 0], sizes = [2, 8], strides = [1, 1]} : vector<8x8xf32> to vector<2x8xf32>
    %cst_41 = arith.constant 1.000000e-16 : f32
    %64 = vector.broadcast %cst_41 : f32 to vector<2x8xf32>
    %65 = arith.maximumf %63, %64 : vector<2x8xf32>
    %66 = math.rsqrt %65 : vector<2x8xf32>
    %67 = arith.mulf %61, %66 : vector<2x8xf32>
    %68 = math.exp %67 : vector<2x8xf32>
    %69 = arith.addf %47, %68 : vector<2x8xf32>
    %70 = arith.mulf %68, %62 : vector<2x8xf32>
    %71 = arith.addf %49, %70 : vector<2x8xf32>
    %c3_i32 = arith.constant 3 : i32
    %c3_i32_42 = arith.constant 3 : i32
    %c3_i32_43 = arith.constant 3 : i32
    %c0_i32_44 = arith.constant 0 : i32
    %c0_i32_45 = arith.constant 0 : i32
    %72 = tpu.memref_slice %arg6[%c3_i32, %c0_i32_44, %c0_i32_45] : memref<8x8x128xf32, #tpu.memory_space<vmem>> -> memref<1x8x128xf32, #tpu.memory_space<vmem>>
    %73 = tpu.memref_squeeze %72 : memref<1x8x128xf32, #tpu.memory_space<vmem>> -> memref<8x128xf32, #tpu.memory_space<vmem>>
    %c0_i32_46 = arith.constant 0 : i32
    %c0_i32_47 = arith.constant 0 : i32
    %74 = tpu.memref_slice %arg6[%c3_i32_42, %c0_i32_46, %c0_i32_47] : memref<8x8x128xf32, #tpu.memory_space<vmem>> -> memref<1x8x128xf32, #tpu.memory_space<vmem>>
    %75 = tpu.memref_squeeze %74 : memref<1x8x128xf32, #tpu.memory_space<vmem>> -> memref<8x128xf32, #tpu.memory_space<vmem>>
    %76 = tpu.memref_slice %arg7[%c3_i32_43] : memref<8x!tpu.dma_semaphore, #tpu.memory_space<semaphore_mem>> -> memref<1x!tpu.dma_semaphore, #tpu.memory_space<semaphore_mem>>
    %77 = tpu.memref_squeeze %76 : memref<1x!tpu.dma_semaphore, #tpu.memory_space<semaphore_mem>> -> memref<!tpu.dma_semaphore, #tpu.memory_space<semaphore_mem>>
    tpu.wait_dma2 semaphore(%77 : memref<!tpu.dma_semaphore, #tpu.memory_space<semaphore_mem>>) src(%73 : memref<8x128xf32, #tpu.memory_space<vmem>>) dst(%75 : memref<8x128xf32, #tpu.memory_space<vmem>>)
    %c3 = arith.constant 3 : index
    %c0_48 = arith.constant 0 : index
    %c0_49 = arith.constant 0 : index
    %78 = vector.load %arg6[%c3, %c0_48, %c0_49] : memref<8x8x128xf32, #tpu.memory_space<vmem>>, vector<1x8x128xf32>
    %79 = vector.shape_cast %78 : vector<1x8x128xf32> to vector<8x128xf32>
    %cst_50 = arith.constant dense<0.000000e+00> : vector<8x8xf32>
    %80 = tpu.matmul %2, %79, %cst_50 {dimension_numbers = #tpu.dot_dimension_numbers<[1], [1], [0], [0], [0, 0, 1, 0], [], []>} : vector<8x128xf32>, vector<8x128xf32>, vector<8x8xf32> -> vector<8x8xf32>
    %81 = arith.mulf %79, %79 : vector<8x128xf32>
    %cst_51 = arith.constant dense<0.000000e+00> : vector<8x8xf32>
    %82 = tpu.matmul %3, %81, %cst_51 {dimension_numbers = #tpu.dot_dimension_numbers<[1], [1], [0], [0], [0, 0, 1, 0], [], []>} : vector<8x128xf32>, vector<8x128xf32>, vector<8x8xf32> -> vector<8x8xf32>
    %83 = vector.extract_strided_slice %80 {offsets = [0, 0], sizes = [2, 8], strides = [1, 1]} : vector<8x8xf32> to vector<2x8xf32>
    %84 = vector.extract_strided_slice %80 {offsets = [2, 0], sizes = [2, 8], strides = [1, 1]} : vector<8x8xf32> to vector<2x8xf32>
    %85 = vector.extract_strided_slice %82 {offsets = [0, 0], sizes = [2, 8], strides = [1, 1]} : vector<8x8xf32> to vector<2x8xf32>
    %cst_52 = arith.constant 1.000000e-16 : f32
    %86 = vector.broadcast %cst_52 : f32 to vector<2x8xf32>
    %87 = arith.maximumf %85, %86 : vector<2x8xf32>
    %88 = math.rsqrt %87 : vector<2x8xf32>
    %89 = arith.mulf %83, %88 : vector<2x8xf32>
    %90 = math.exp %89 : vector<2x8xf32>
    %91 = arith.addf %69, %90 : vector<2x8xf32>
    %92 = arith.mulf %90, %84 : vector<2x8xf32>
    %93 = arith.addf %71, %92 : vector<2x8xf32>
    %c4_i32 = arith.constant 4 : i32
    %c4_i32_53 = arith.constant 4 : i32
    %c4_i32_54 = arith.constant 4 : i32
    %c0_i32_55 = arith.constant 0 : i32
    %c0_i32_56 = arith.constant 0 : i32
    %94 = tpu.memref_slice %arg6[%c4_i32, %c0_i32_55, %c0_i32_56] : memref<8x8x128xf32, #tpu.memory_space<vmem>> -> memref<1x8x128xf32, #tpu.memory_space<vmem>>
    %95 = tpu.memref_squeeze %94 : memref<1x8x128xf32, #tpu.memory_space<vmem>> -> memref<8x128xf32, #tpu.memory_space<vmem>>
    %c0_i32_57 = arith.constant 0 : i32
    %c0_i32_58 = arith.constant 0 : i32
    %96 = tpu.memref_slice %arg6[%c4_i32_53, %c0_i32_57, %c0_i32_58] : memref<8x8x128xf32, #tpu.memory_space<vmem>> -> memref<1x8x128xf32, #tpu.memory_space<vmem>>
    %97 = tpu.memref_squeeze %96 : memref<1x8x128xf32, #tpu.memory_space<vmem>> -> memref<8x128xf32, #tpu.memory_space<vmem>>
    %98 = tpu.memref_slice %arg7[%c4_i32_54] : memref<8x!tpu.dma_semaphore, #tpu.memory_space<semaphore_mem>> -> memref<1x!tpu.dma_semaphore, #tpu.memory_space<semaphore_mem>>
    %99 = tpu.memref_squeeze %98 : memref<1x!tpu.dma_semaphore, #tpu.memory_space<semaphore_mem>> -> memref<!tpu.dma_semaphore, #tpu.memory_space<semaphore_mem>>
    tpu.wait_dma2 semaphore(%99 : memref<!tpu.dma_semaphore, #tpu.memory_space<semaphore_mem>>) src(%95 : memref<8x128xf32, #tpu.memory_space<vmem>>) dst(%97 : memref<8x128xf32, #tpu.memory_space<vmem>>)
    %c4 = arith.constant 4 : index
    %c0_59 = arith.constant 0 : index
    %c0_60 = arith.constant 0 : index
    %100 = vector.load %arg6[%c4, %c0_59, %c0_60] : memref<8x8x128xf32, #tpu.memory_space<vmem>>, vector<1x8x128xf32>
    %101 = vector.shape_cast %100 : vector<1x8x128xf32> to vector<8x128xf32>
    %cst_61 = arith.constant dense<0.000000e+00> : vector<8x8xf32>
    %102 = tpu.matmul %2, %101, %cst_61 {dimension_numbers = #tpu.dot_dimension_numbers<[1], [1], [0], [0], [0, 0, 1, 0], [], []>} : vector<8x128xf32>, vector<8x128xf32>, vector<8x8xf32> -> vector<8x8xf32>
    %103 = arith.mulf %101, %101 : vector<8x128xf32>
    %cst_62 = arith.constant dense<0.000000e+00> : vector<8x8xf32>
    %104 = tpu.matmul %3, %103, %cst_62 {dimension_numbers = #tpu.dot_dimension_numbers<[1], [1], [0], [0], [0, 0, 1, 0], [], []>} : vector<8x128xf32>, vector<8x128xf32>, vector<8x8xf32> -> vector<8x8xf32>
    %105 = vector.extract_strided_slice %102 {offsets = [0, 0], sizes = [2, 8], strides = [1, 1]} : vector<8x8xf32> to vector<2x8xf32>
    %106 = vector.extract_strided_slice %102 {offsets = [2, 0], sizes = [2, 8], strides = [1, 1]} : vector<8x8xf32> to vector<2x8xf32>
    %107 = vector.extract_strided_slice %104 {offsets = [0, 0], sizes = [2, 8], strides = [1, 1]} : vector<8x8xf32> to vector<2x8xf32>
    %cst_63 = arith.constant 1.000000e-16 : f32
    %108 = vector.broadcast %cst_63 : f32 to vector<2x8xf32>
    %109 = arith.maximumf %107, %108 : vector<2x8xf32>
    %110 = math.rsqrt %109 : vector<2x8xf32>
    %111 = arith.mulf %105, %110 : vector<2x8xf32>
    %112 = math.exp %111 : vector<2x8xf32>
    %113 = arith.addf %91, %112 : vector<2x8xf32>
    %114 = arith.mulf %112, %106 : vector<2x8xf32>
    %115 = arith.addf %93, %114 : vector<2x8xf32>
    %c5_i32 = arith.constant 5 : i32
    %c5_i32_64 = arith.constant 5 : i32
    %c5_i32_65 = arith.constant 5 : i32
    %c0_i32_66 = arith.constant 0 : i32
    %c0_i32_67 = arith.constant 0 : i32
    %116 = tpu.memref_slice %arg6[%c5_i32, %c0_i32_66, %c0_i32_67] : memref<8x8x128xf32, #tpu.memory_space<vmem>> -> memref<1x8x128xf32, #tpu.memory_space<vmem>>
    %117 = tpu.memref_squeeze %116 : memref<1x8x128xf32, #tpu.memory_space<vmem>> -> memref<8x128xf32, #tpu.memory_space<vmem>>
    %c0_i32_68 = arith.constant 0 : i32
    %c0_i32_69 = arith.constant 0 : i32
    %118 = tpu.memref_slice %arg6[%c5_i32_64, %c0_i32_68, %c0_i32_69] : memref<8x8x128xf32, #tpu.memory_space<vmem>> -> memref<1x8x128xf32, #tpu.memory_space<vmem>>
    %119 = tpu.memref_squeeze %118 : memref<1x8x128xf32, #tpu.memory_space<vmem>> -> memref<8x128xf32, #tpu.memory_space<vmem>>
    %120 = tpu.memref_slice %arg7[%c5_i32_65] : memref<8x!tpu.dma_semaphore, #tpu.memory_space<semaphore_mem>> -> memref<1x!tpu.dma_semaphore, #tpu.memory_space<semaphore_mem>>
    %121 = tpu.memref_squeeze %120 : memref<1x!tpu.dma_semaphore, #tpu.memory_space<semaphore_mem>> -> memref<!tpu.dma_semaphore, #tpu.memory_space<semaphore_mem>>
    tpu.wait_dma2 semaphore(%121 : memref<!tpu.dma_semaphore, #tpu.memory_space<semaphore_mem>>) src(%117 : memref<8x128xf32, #tpu.memory_space<vmem>>) dst(%119 : memref<8x128xf32, #tpu.memory_space<vmem>>)
    %c5 = arith.constant 5 : index
    %c0_70 = arith.constant 0 : index
    %c0_71 = arith.constant 0 : index
    %122 = vector.load %arg6[%c5, %c0_70, %c0_71] : memref<8x8x128xf32, #tpu.memory_space<vmem>>, vector<1x8x128xf32>
    %123 = vector.shape_cast %122 : vector<1x8x128xf32> to vector<8x128xf32>
    %cst_72 = arith.constant dense<0.000000e+00> : vector<8x8xf32>
    %124 = tpu.matmul %2, %123, %cst_72 {dimension_numbers = #tpu.dot_dimension_numbers<[1], [1], [0], [0], [0, 0, 1, 0], [], []>} : vector<8x128xf32>, vector<8x128xf32>, vector<8x8xf32> -> vector<8x8xf32>
    %125 = arith.mulf %123, %123 : vector<8x128xf32>
    %cst_73 = arith.constant dense<0.000000e+00> : vector<8x8xf32>
    %126 = tpu.matmul %3, %125, %cst_73 {dimension_numbers = #tpu.dot_dimension_numbers<[1], [1], [0], [0], [0, 0, 1, 0], [], []>} : vector<8x128xf32>, vector<8x128xf32>, vector<8x8xf32> -> vector<8x8xf32>
    %127 = vector.extract_strided_slice %124 {offsets = [0, 0], sizes = [2, 8], strides = [1, 1]} : vector<8x8xf32> to vector<2x8xf32>
    %128 = vector.extract_strided_slice %124 {offsets = [2, 0], sizes = [2, 8], strides = [1, 1]} : vector<8x8xf32> to vector<2x8xf32>
    %129 = vector.extract_strided_slice %126 {offsets = [0, 0], sizes = [2, 8], strides = [1, 1]} : vector<8x8xf32> to vector<2x8xf32>
    %cst_74 = arith.constant 1.000000e-16 : f32
    %130 = vector.broadcast %cst_74 : f32 to vector<2x8xf32>
    %131 = arith.maximumf %129, %130 : vector<2x8xf32>
    %132 = math.rsqrt %131 : vector<2x8xf32>
    %133 = arith.mulf %127, %132 : vector<2x8xf32>
    %134 = math.exp %133 : vector<2x8xf32>
    %135 = arith.addf %113, %134 : vector<2x8xf32>
    %136 = arith.mulf %134, %128 : vector<2x8xf32>
    %137 = arith.addf %115, %136 : vector<2x8xf32>
    %c6_i32 = arith.constant 6 : i32
    %c6_i32_75 = arith.constant 6 : i32
    %c6_i32_76 = arith.constant 6 : i32
    %c0_i32_77 = arith.constant 0 : i32
    %c0_i32_78 = arith.constant 0 : i32
    %138 = tpu.memref_slice %arg6[%c6_i32, %c0_i32_77, %c0_i32_78] : memref<8x8x128xf32, #tpu.memory_space<vmem>> -> memref<1x8x128xf32, #tpu.memory_space<vmem>>
    %139 = tpu.memref_squeeze %138 : memref<1x8x128xf32, #tpu.memory_space<vmem>> -> memref<8x128xf32, #tpu.memory_space<vmem>>
    %c0_i32_79 = arith.constant 0 : i32
    %c0_i32_80 = arith.constant 0 : i32
    %140 = tpu.memref_slice %arg6[%c6_i32_75, %c0_i32_79, %c0_i32_80] : memref<8x8x128xf32, #tpu.memory_space<vmem>> -> memref<1x8x128xf32, #tpu.memory_space<vmem>>
    %141 = tpu.memref_squeeze %140 : memref<1x8x128xf32, #tpu.memory_space<vmem>> -> memref<8x128xf32, #tpu.memory_space<vmem>>
    %142 = tpu.memref_slice %arg7[%c6_i32_76] : memref<8x!tpu.dma_semaphore, #tpu.memory_space<semaphore_mem>> -> memref<1x!tpu.dma_semaphore, #tpu.memory_space<semaphore_mem>>
    %143 = tpu.memref_squeeze %142 : memref<1x!tpu.dma_semaphore, #tpu.memory_space<semaphore_mem>> -> memref<!tpu.dma_semaphore, #tpu.memory_space<semaphore_mem>>
    tpu.wait_dma2 semaphore(%143 : memref<!tpu.dma_semaphore, #tpu.memory_space<semaphore_mem>>) src(%139 : memref<8x128xf32, #tpu.memory_space<vmem>>) dst(%141 : memref<8x128xf32, #tpu.memory_space<vmem>>)
    %c6 = arith.constant 6 : index
    %c0_81 = arith.constant 0 : index
    %c0_82 = arith.constant 0 : index
    %144 = vector.load %arg6[%c6, %c0_81, %c0_82] : memref<8x8x128xf32, #tpu.memory_space<vmem>>, vector<1x8x128xf32>
    %145 = vector.shape_cast %144 : vector<1x8x128xf32> to vector<8x128xf32>
    %cst_83 = arith.constant dense<0.000000e+00> : vector<8x8xf32>
    %146 = tpu.matmul %2, %145, %cst_83 {dimension_numbers = #tpu.dot_dimension_numbers<[1], [1], [0], [0], [0, 0, 1, 0], [], []>} : vector<8x128xf32>, vector<8x128xf32>, vector<8x8xf32> -> vector<8x8xf32>
    %147 = arith.mulf %145, %145 : vector<8x128xf32>
    %cst_84 = arith.constant dense<0.000000e+00> : vector<8x8xf32>
    %148 = tpu.matmul %3, %147, %cst_84 {dimension_numbers = #tpu.dot_dimension_numbers<[1], [1], [0], [0], [0, 0, 1, 0], [], []>} : vector<8x128xf32>, vector<8x128xf32>, vector<8x8xf32> -> vector<8x8xf32>
    %149 = vector.extract_strided_slice %146 {offsets = [0, 0], sizes = [2, 8], strides = [1, 1]} : vector<8x8xf32> to vector<2x8xf32>
    %150 = vector.extract_strided_slice %146 {offsets = [2, 0], sizes = [2, 8], strides = [1, 1]} : vector<8x8xf32> to vector<2x8xf32>
    %151 = vector.extract_strided_slice %148 {offsets = [0, 0], sizes = [2, 8], strides = [1, 1]} : vector<8x8xf32> to vector<2x8xf32>
    %cst_85 = arith.constant 1.000000e-16 : f32
    %152 = vector.broadcast %cst_85 : f32 to vector<2x8xf32>
    %153 = arith.maximumf %151, %152 : vector<2x8xf32>
    %154 = math.rsqrt %153 : vector<2x8xf32>
    %155 = arith.mulf %149, %154 : vector<2x8xf32>
    %156 = math.exp %155 : vector<2x8xf32>
    %157 = arith.addf %135, %156 : vector<2x8xf32>
    %158 = arith.mulf %156, %150 : vector<2x8xf32>
    %159 = arith.addf %137, %158 : vector<2x8xf32>
    %c7_i32 = arith.constant 7 : i32
    %c7_i32_86 = arith.constant 7 : i32
    %c7_i32_87 = arith.constant 7 : i32
    %c0_i32_88 = arith.constant 0 : i32
    %c0_i32_89 = arith.constant 0 : i32
    %160 = tpu.memref_slice %arg6[%c7_i32, %c0_i32_88, %c0_i32_89] : memref<8x8x128xf32, #tpu.memory_space<vmem>> -> memref<1x8x128xf32, #tpu.memory_space<vmem>>
    %161 = tpu.memref_squeeze %160 : memref<1x8x128xf32, #tpu.memory_space<vmem>> -> memref<8x128xf32, #tpu.memory_space<vmem>>
    %c0_i32_90 = arith.constant 0 : i32
    %c0_i32_91 = arith.constant 0 : i32
    %162 = tpu.memref_slice %arg6[%c7_i32_86, %c0_i32_90, %c0_i32_91] : memref<8x8x128xf32, #tpu.memory_space<vmem>> -> memref<1x8x128xf32, #tpu.memory_space<vmem>>
    %163 = tpu.memref_squeeze %162 : memref<1x8x128xf32, #tpu.memory_space<vmem>> -> memref<8x128xf32, #tpu.memory_space<vmem>>
    %164 = tpu.memref_slice %arg7[%c7_i32_87] : memref<8x!tpu.dma_semaphore, #tpu.memory_space<semaphore_mem>> -> memref<1x!tpu.dma_semaphore, #tpu.memory_space<semaphore_mem>>
    %165 = tpu.memref_squeeze %164 : memref<1x!tpu.dma_semaphore, #tpu.memory_space<semaphore_mem>> -> memref<!tpu.dma_semaphore, #tpu.memory_space<semaphore_mem>>
    tpu.wait_dma2 semaphore(%165 : memref<!tpu.dma_semaphore, #tpu.memory_space<semaphore_mem>>) src(%161 : memref<8x128xf32, #tpu.memory_space<vmem>>) dst(%163 : memref<8x128xf32, #tpu.memory_space<vmem>>)
    %c7 = arith.constant 7 : index
    %c0_92 = arith.constant 0 : index
    %c0_93 = arith.constant 0 : index
    %166 = vector.load %arg6[%c7, %c0_92, %c0_93] : memref<8x8x128xf32, #tpu.memory_space<vmem>>, vector<1x8x128xf32>
    %167 = vector.shape_cast %166 : vector<1x8x128xf32> to vector<8x128xf32>
    %cst_94 = arith.constant dense<0.000000e+00> : vector<8x8xf32>
    %168 = tpu.matmul %2, %167, %cst_94 {dimension_numbers = #tpu.dot_dimension_numbers<[1], [1], [0], [0], [0, 0, 1, 0], [], []>} : vector<8x128xf32>, vector<8x128xf32>, vector<8x8xf32> -> vector<8x8xf32>
    %169 = arith.mulf %167, %167 : vector<8x128xf32>
    %cst_95 = arith.constant dense<0.000000e+00> : vector<8x8xf32>
    %170 = tpu.matmul %3, %169, %cst_95 {dimension_numbers = #tpu.dot_dimension_numbers<[1], [1], [0], [0], [0, 0, 1, 0], [], []>} : vector<8x128xf32>, vector<8x128xf32>, vector<8x8xf32> -> vector<8x8xf32>
    %171 = vector.extract_strided_slice %168 {offsets = [0, 0], sizes = [2, 8], strides = [1, 1]} : vector<8x8xf32> to vector<2x8xf32>
    %172 = vector.extract_strided_slice %168 {offsets = [2, 0], sizes = [2, 8], strides = [1, 1]} : vector<8x8xf32> to vector<2x8xf32>
    %173 = vector.extract_strided_slice %170 {offsets = [0, 0], sizes = [2, 8], strides = [1, 1]} : vector<8x8xf32> to vector<2x8xf32>
    %cst_96 = arith.constant 1.000000e-16 : f32
    %174 = vector.broadcast %cst_96 : f32 to vector<2x8xf32>
    %175 = arith.maximumf %173, %174 : vector<2x8xf32>
    %176 = math.rsqrt %175 : vector<2x8xf32>
    %177 = arith.mulf %171, %176 : vector<2x8xf32>
    %178 = math.exp %177 : vector<2x8xf32>
    %179 = arith.addf %157, %178 : vector<2x8xf32>
    %180 = arith.mulf %178, %172 : vector<2x8xf32>
    %181 = arith.addf %159, %180 : vector<2x8xf32>
    %cst_97 = arith.constant 9.99999996E-13 : f32
    %182 = vector.broadcast %cst_97 : f32 to vector<2x8xf32>
    %183 = arith.maximumf %179, %182 : vector<2x8xf32>
    %184 = tpu.reciprocal %183 : vector<2x8xf32> -> vector<2x8xf32>
    %185 = arith.mulf %181, %184 : vector<2x8xf32>
    %186 = vector.extract_strided_slice %185 {offsets = [0, 0], sizes = [1, 8], strides = [1, 1]} : vector<2x8xf32> to vector<1x8xf32>
    %187 = vector.extract_strided_slice %185 {offsets = [1, 0], sizes = [1, 8], strides = [1, 1]} : vector<2x8xf32> to vector<1x8xf32>
    %188 = arith.addf %186, %187 : vector<1x8xf32>
    %c0_98 = arith.constant 0 : index
    %c0_99 = arith.constant 0 : index
    %c0_100 = arith.constant 0 : index
    %189 = vector.load %arg5[%c0_98, %c0_99, %c0_100] : memref<1x1x8xf32, #tpu.memory_space<vmem>>, vector<1x1x8xf32>
    %190 = vector.shape_cast %189 : vector<1x1x8xf32> to vector<1x8xf32>
    %191 = vector.shape_cast %188 : vector<1x8xf32> to vector<1x1x8xf32>
    tpu.vector_store %arg5[%c0_98, %c0_99, %c0_100], %191 {strides = array<i32>} : memref<1x1x8xf32, #tpu.memory_space<vmem>>, vector<1x1x8xf32>,
    return
  }
  func.func @transform_0(%arg0: i32, %arg1: memref<64xi32, #tpu.memory_space<smem>>) -> (i32, i32) {
    %c0_i32 = arith.constant 0 : i32
    %c0_i32_0 = arith.constant 0 : i32
    %c0_i32_1 = arith.constant 0 : i32
    return %c0_i32, %c0_i32_0 : i32, i32
  }
  func.func @transform_1(%arg0: i32, %arg1: memref<64xi32, #tpu.memory_space<smem>>) -> (i32, i32) {
    %c0_i32 = arith.constant 0 : i32
    %c0_i32_0 = arith.constant 0 : i32
    %c0_i32_1 = arith.constant 0 : i32
    return %c0_i32, %c0_i32_0 : i32, i32
  }
  func.func @transform_3(%arg0: i32, %arg1: memref<64xi32, #tpu.memory_space<smem>>) -> (i32, i32, i32) {
    %c0_i32 = arith.constant 0 : i32
    %c0_i32_0 = arith.constant 0 : i32
    %c0_i32_1 = arith.constant 0 : i32
    return %arg0, %c0_i32, %c0_i32_0 : i32, i32, i32
  }
}

</mosaic_0001>

<bundles_post_ra>
// kernel: tpu_custom_call.1
= control target key start
LH: loop header
LB: loop body
LE: loop exit
PB: predicated region body
PF: predicated region fallthrough
CT: control target
= control target key end

     0   :  { %s1924_s0 = inlined_call_operand.hbm [shape: s32[64], index: 0, kind: input, shape index: {}]   ;;  %s1925_s1 = inlined_call_operand.hbm [shape: f32[8,128], index: 1, kind: input, shape index: {}]   ;;  %s1926_s2 = inlined_call_operand.hbm [shape: f32[8,128], index: 2, kind: input, shape index: {}]   ;;  %s1927_s3 = inlined_call_operand.hbm [shape: f32[64,128], index: 3, kind: input, shape index: {}]   ;;  %s1928_s4 = inlined_call_operand.hbm [shape: f32[1,1,8], index: 4, kind: output, shape index: {}]  }
   0x1   :  { %s1606_s17 = scalar_lea.hbm %s1924_s0, 16 }
   0x2   :  { %p1607_p0 = scmp.ne.s32.totalorder %s1924_s0, %s1606_s17  ;;  %p1610_p1 = scmp.lt.u32.totalorder %s1606_s17, %s1924_s0 }
   0x4   :  { %p1612_p2 = pnand %p1610_p1, %p1607_p0 }
   0x6   :  { %1615 = shalt.err (!%p1612_p2)  }
   0x7   :  { %s1746_s22 = smov [#allocation5]  }
   0x8   :  { %10 = dma.hbm_to_smem %s1924_s0, 16, %s1746_s22, [#allocation4] }
   0x9   :  { %1714 = dma.done.wait [#allocation4], 16 }
   0xa   :  { %1715 = vsyncadd [#allocation4], 4294967280 }
   0xb   :  { %12 = sfence }
   0xc   :  { %13 = vsyncpa [#allocation7], 0 }
   0xd   :  { %14 = vsyncpa [#allocation10], 0 }
   0xe   :  { %15 = vsyncpa [#allocation8], 0  ;;  %s1747_s25 = smov [#allocation6]   ;;  %s1748_s27 = smov [#allocation9]  }
   0xf   :  { %s22_s26 = sshll.u32 %s1747_s25, 4  ;;  %s32_s28 = sshll.u32 %s1748_s27, 4  ;;  %s23_s26 = int_to_ptr.vmem [resolvable:$true] %s22_s26  ;;  %s33_s28 = int_to_ptr.vmem [resolvable:$true] %s32_s28 }
  0x10   :  { %s1616_s5 = scalar_lea.hbm %s1925_s1, 128 }
  0x11   :  { %p1617_p3 = scmp.ne.s32.totalorder %s1925_s1, %s1616_s5  ;;  %p1620_p4 = scmp.lt.u32.totalorder %s1616_s5, %s1925_s1 }
  0x13   :  { %p1622_p5 = pnand %p1620_p4, %p1617_p3 }
  0x15   :  { %1625 = shalt.err (!%p1622_p5)
}
  0x16   :  { %s1626_s9 = scalar_lea.vmem %s23_s26, 128  ;;  %p1631_p7 = scmp.lt.s32.totalorder %s23_s26, %s23_s26 }
  0x17   :  { %p1627_p6 = scmp.ne.s32.totalorder %s23_s26, %s1626_s9  ;;  %p1632_p8 = scmp.lt.s32.totalorder %s1626_s9, %s1626_s9 }
  0x19   :  { %p1633_p9 = por %p1632_p8, %p1631_p7 }
  0x1b   :  { %p1634_p10 = pnand %p1633_p9, %p1627_p6 }
  0x1d   :  { %1637 = shalt.err (!%p1634_p10)
}
  0x1e   :  { %25 = dma.hbm_to_vmem [thread:$0]  %s1925_s1, 128, %s23_s26, [#allocation7]  }
  0x1f   :  { %s1638_s14 = scalar_lea.hbm %s1926_s2, 128 }
  0x20   :  { %p1639_p11 = scmp.ne.s32.totalorder %s1926_s2, %s1638_s14  ;;  %p1642_p12 = scmp.lt.u32.totalorder %s1638_s14, %s1926_s2 }
  0x22   :  { %p1644_p13 = pnand %p1642_p12, %p1639_p11 }
  0x24   :  { %1647 = shalt.err (!%p1644_p13)
}
  0x25   :  { %s1648_s19 = scalar_lea.vmem %s33_s28, 128  ;;  %p1653_p1 = scmp.lt.s32.totalorder %s33_s28, %s33_s28 }
  0x26   :  { %p1649_p0 = scmp.ne.s32.totalorder %s33_s28, %s1648_s19  ;;  %p1654_p2 = scmp.lt.s32.totalorder %s1648_s19, %s1648_s19 }
  0x28   :  { %p1655_p3 = por %p1654_p2, %p1653_p1 }
  0x2a   :  { %p1656_p4 = pnand %p1655_p3, %p1649_p0 }
  0x2c   :  { %1659 = shalt.err (!%p1656_p4)
}
  0x2d   :  { %35 = dma.hbm_to_vmem [thread:$0]  %s1926_s2, 128, %s33_s28, [#allocation10]  }
  0x2e   :  { %1716 = dma.done.wait [#allocation7], 128  }
  0x2f   :  { %1717 = vsyncadd [#allocation7], 4294967168 }
  0x30   :  { %1718 = dma.done.wait [#allocation10], 128  }
  0x31   :  { %1719 = vsyncadd [#allocation10], 4294967168  ;;  %s1814_s21 = smov 0  }
  0x32 LB: > { %s1428_s22 = sshll.u32 %s1740_s21, 3  ;;  %s1820_s23 = smov 0   ;;  %s1740_s21 = sphi %s1814_s21, %s48_s21  }
  0x33 LB: >> { %s57_s2 = sadd.s32 %s1744_s23, %s1428_s22  ;;  %s63_s5 = scalar_lea.sflag [#allocation3], %s1740_s21  ;;  %s1744_s23 = sphi %s1820_s23, %s56_s23  }
  0x34   : >> { %s58_s24 = sld [smem:[#allocation5 + %s57_s2]]  ;;  %s62_s25 = scalar_lea.vmem [#allocation2], %s57_s2 }
  0x35   : >> { %s71_s26 = sshll.u32 %s62_s25, 4  ;;  %s1662_s8 = scalar_lea.hbm %s1927_s3, 1024  ;;  %s72_s26 = int_to_ptr.vmem [resolvable:$true] %s71_s26 }
  0x3a   : >> { %s1429_s27 = sshll.u32 %s58_s24, 4 }
  0x3b   : >> { %s60_s30 = scalar_lea.hbm %s1927_s3, %s1429_s27 }
  0x3c   : >> { %s1660_s6 = scalar_lea.hbm %s60_s30, 16  ;;  %p1663_p6 = scmp.lt.u32.totalorder %s60_s30, %s1927_s3 }
  0x3d   : >> { %p1661_p5 = scmp.ne.s32.totalorder %s60_s30, %s1660_s6  ;;  %p1664_p7 = scmp.lt.u32.totalorder %s1662_s8, %s1660_s6 }
  0x3e   : >> { %p1666_p9 = scmp.lt.u32.totalorder %s1660_s6, %s60_s30 }
  0x3f   : >> { %p1665_p8 = por %p1664_p7, %p1663_p6 }
  0x41   : >> { %p1667_p10 = por %p1666_p9, %p1665_p8 }
  0x43   : >> { %p1668_p11 = pnand %p1667_p10, %p1661_p5 }
  0x45   : >> { %1671 = shalt.err (!%p1668_p11)  }
  0x46   : >> { %s1672_s11 = scalar_lea.vmem %s72_s26, 16  ;;  %s1749_s12 = smov [#allocation2]  }
  0x47   : >> { %p1673_p12 = scmp.ne.s32.totalorder %s72_s26, %s1672_s11  ;;  %s1674_s13 = sshll.u32 %s1749_s12, 4  ;;  %s1675_s13 = int_to_ptr.vmem [resolvable:$false] %s1674_s13 }
  0x48   : >> { %s1676_s14 = scalar_lea.vmem %s1675_s13, 1024  ;;  %p1677_p13 = scmp.lt.s32.totalorder %s72_s26, %s1675_s13 }
  0x49   : >> { %p1678_p0 = scmp.lt.s32.totalorder %s1676_s14, %s1672_s11 }
  0x4b   : >> { %p1679_p1 = por %p1678_p0, %p1677_p13 }
  0x4d   : >> { %p1680_p2 = pnand %p1679_p1, %p1673_p12 }
  0x4f   : >> { %1683 = shalt.err (!%p1680_p2)  }
  0x50   : >> { %74 = dma.hbm_to_vmem [thread:$0]  %s60_s30, 16, %s72_s26, %s63_s5 }
  0x51   : >> { %s56_s23 = sadd.s32 1, %s1744_s23  }
  0x52   : >> { %p53_p3 = scmp.ge.s32.totalorder %s56_s23, 8  }
  0x53   : > { %s48_s21 = sadd.s32 (%p53_p3), 1, %s1740_s21  }
  0x54   : > { %55 = sbr.rel (!%p53_p3) target bundleno = 51 (0x33), region = 78  ;;  %p45_p4 = scmp.ge.s32.totalorder (%p53_p3), %s48_s21, 8  }
  0x5b   :  { %47 = sbr.rel (!%p45_p4) target bundleno = 50 (0x32), region = 89  ;;  %v1844_v0 = vld [vmem:[#allocation6] sm:$0xff] (%p45_p4)  ;;  %v1846_v1 = vld [vmem:[#allocation9] sm:$0xff] (%p45_p4) }
  0x62   :  { %1720 = dma.done.wait [#allocation3], 128 }
  0x63   :  { %1721 = vsyncadd [#allocation3], 4294967168  ;;  %v1750_v2 = vmov 0.0   ;;  %vm1751_vm0 = vmmov 0   ;;  %v80_v3 = vld [vmem:[#allocation2] sm:$0xff] }
  0x64   :  { %1475 = vmatprep.subr.mxu1 %v1750_v2  ;;  %1477 = vmatprep.mubr.msk.f32.mxu1 %vm1751_vm0, %v1750_v2  ;;  %v151_v4 = vmul.f32 %v80_v3, %v80_v3 }
  0x65   :  { %1470 = vmatprep.subr.mxu0 %v1750_v2  ;;  %1472 = vmatprep.mubr.msk.f32.mxu0 %vm1751_vm0, %v1750_v2 }
  0x66   :  { %1471 = vmatpush3.xpose.msra.mxu0 %v80_v3  ;;  %1476 = vmatpush3.xpose.msra.mxu1 %v151_v4 }
  0x69   :  { %1473 = vmatmul.mubr.f32.vlgmr.msra.gmra.mrb[0].mxu0 %v1844_v0  ;;  %1478 = vmatmul.mubr.f32.vlgmr.msra.gmra.mrb[0].mxu1 %v1846_v1 }
 0x13c   :  { %v147_v5 = vpop.f32.mrb[0].mxu0  ;;  %v218_v7 = vpop.f32.mrb[0].mxu1 }
 0x13d   :  { %v1474_v6 = vpop.f32.mrb[1].mxu0  ;;  %v222_v8 = vmax.f32 %v218_v7, 1e-16  ;;  %v1479_v9 = vpop.f32.mrb[1].mxu1  ;;  %v229_v13 = vrot.slane %v147_v5, 2 }
 0x13f   :  { %1572 = vrsqrt.f32 %v222_v8 }
 0x149   :  { %v1573_v10 = vpop.eup %1572 }
 0x14a   :  { %v224_v11 = vmul.f32 %v1573_v10, %v147_v5 }
 0x14c   :  { %v225_v12 = vmul.f32 1.442695, %v224_v11 }
 0x14e   :  { %1574 = vpow2.f32 %v225_v12 }
 0x158   :  { %v1575_v14 = vpop.eup %1574 }
 0x159   :  { %v231_v15 = vmul.f32 %v1575_v14, %v229_v13 }
 0x15a   :  { %1722 = dma.done.wait [#allocation3 + $0x1], 128 }
 0x15b   :  { %1723 = vsyncadd [#allocation3 + $0x1], 4294967168  ;;  %1485 = vmatprep.subr.mxu1 %v1750_v2  ;;  %1487 = vmatprep.mubr.msk.f32.mxu1 %vm1751_vm0, %v1750_v2  ;;  %v237_v16 = vld [vmem:[#allocation2 + $0x8] sm:$0xff] }
 0x15c   :  { %1480 = vmatprep.subr.mxu0 %v1750_v2  ;;  %1482 = vmatprep.mubr.msk.f32.mxu0 %vm1751_vm0, %v1750_v2  ;;  %v308_v17 = vmul.f32 %v237_v16, %v237_v16 }
 0x15d   :  { %1481 = vmatpush3.xpose.msra.mxu0 %v237_v16 }
 0x15e   :  { %1486 = vmatpush3.xpose.msra.mxu1 %v308_v17 }
 0x160   :  { %1483 = vmatmul.mubr.f32.vlgmr.msra.gmra.mrb[2].mxu0 %v1844_v0 }
 0x161   :  { %1488 = vmatmul.mubr.f32.vlgmr.msra.gmra.mrb[2].mxu1 %v1846_v1 }
 0x233   :  { %v304_v18 = vpop.f32.mrb[2].mxu0 }
 0x234   :  { %v1484_v19 = vpop.f32.mrb[3].mxu0  ;;  %v375_v20 = vpop.f32.mrb[2].mxu1  ;;  %v386_v26 = vrot.slane %v304_v18, 2 }
 0x235   :  { %v379_v21 = vmax.f32 %v375_v20, 1e-16  ;;  %v1489_v22 = vpop.f32.mrb[3].mxu1 }
 0x237   :  { %1576 = vrsqrt.f32 %v379_v21 }
 0x241   :  { %v1577_v23 = vpop.eup %1576 }
 0x242   :  { %v381_v24 = vmul.f32 %v1577_v23, %v304_v18 }
 0x244   :  { %v382_v25 = vmul.f32 1.442695, %v381_v24 }
 0x246   :  { %1578 = vpow2.f32 %v382_v25 }
 0x250   :  { %v1579_v27 = vpop.eup %1578 }
 0x251   :  { %v384_v28 = vadd.f32 %v1579_v27, %v1575_v14  ;;  %v388_v29 = vmul.f32 %v1579_v27, %v386_v26 }
 0x253   :  { %v389_v30 = vadd.f32 %v388_v29, %v231_v15 }
 0x254   :  { %1724 = dma.done.wait [#allocation3 + $0x2], 128 }
 0x255   :  { %1725 = vsyncadd [#allocation3 + $0x2], 4294967168  ;;  %1495 = vmatprep.subr.mxu1 %v1750_v2  ;;  %1497 = vmatprep.mubr.msk.f32.mxu1 %vm1751_vm0, %v1750_v2  ;;  %v394_v31 = vld [vmem:[#allocation2 + $0x10] sm:$0xff] }
 0x256   :  { %1490 = vmatprep.subr.mxu0 %v1750_v2  ;;  %1492 = vmatprep.mubr.msk.f32.mxu0 %vm1751_vm0, %v1750_v2  ;;  %v465_v32 = vmul.f32 %v394_v31, %v394_v31 }
 0x257   :  { %1491 = vmatpush3.xpose.msra.mxu0 %v394_v31 }
 0x258   :  { %1496 = vmatpush3.xpose.msra.mxu1 %v465_v32 }
 0x25a   :  { %1493 = vmatmul.mubr.f32.vlgmr.msra.gmra.mrb[4].mxu0 %v1844_v0 }
 0x25b   :  { %1498 = vmatmul.mubr.f32.vlgmr.msra.gmra.mrb[4].mxu1 %v1846_v1 }
 0x32d   :  { %v461_v33 = vpop.f32.mrb[4].mxu0 }
 0x32e   :  { %v1494_v34 = vpop.f32.mrb[5].mxu0  ;;  %v532_v35 = vpop.f32.mrb[4].mxu1  ;;  %v543_v41 = vrot.slane %v461_v33, 2 }
 0x32f   :  { %v536_v36 = vmax.f32 %v532_v35, 1e-16  ;;  %v1499_v37 = vpop.f32.mrb[5].mxu1 }
 0x331   :  { %1580 = vrsqrt.f32 %v536_v36 }
 0x33b   :  { %v1581_v38 = vpop.eup %1580 }
 0x33c   :  { %v538_v39 = vmul.f32 %v1581_v38, %v461_v33 }
 0x33e   :  { %v539_v40 = vmul.f32 1.442695, %v538_v39 }
 0x340   :  { %1582 = vpow2.f32 %v539_v40 }
 0x34a   :  { %v1583_v42 = vpop.eup %1582 }
 0x34b   :  { %v541_v43 = vadd.f32 %v1583_v42, %v384_v28  ;;  %v545_v44 = vmul.f32 %v1583_v42, %v543_v41 }
 0x34d   :  { %v546_v45 = vadd.f32 %v545_v44, %v389_v30 }
 0x34e   :  { %1726 = dma.done.wait [#allocation3 + $0x3], 128 }
 0x34f   :  { %1727 = vsyncadd [#allocation3 + $0x3], 4294967168  ;;  %1505 = vmatprep.subr.mxu1 %v1750_v2  ;;  %1507 = vmatprep.mubr.msk.f32.mxu1 %vm1751_vm0, %v1750_v2  ;;  %v551_v46 = vld [vmem:[#allocation2 + $0x18] sm:$0xff] }
 0x350   :  { %1500 = vmatprep.subr.mxu0 %v1750_v2  ;;  %1502 = vmatprep.mubr.msk.f32.mxu0 %vm1751_vm0, %v1750_v2  ;;  %v622_v47 = vmul.f32 %v551_v46, %v551_v46 }
 0x351   :  { %1501 = vmatpush3.xpose.msra.mxu0 %v551_v46 }
 0x352   :  { %1506 = vmatpush3.xpose.msra.mxu1 %v622_v47 }
 0x354   :  { %1503 = vmatmul.mubr.f32.vlgmr.msra.gmra.mrb[6].mxu0 %v1844_v0 }
 0x355   :  { %1508 = vmatmul.mubr.f32.vlgmr.msra.gmra.mrb[6].mxu1 %v1846_v1 }
 0x427   :  { %v618_v48 = vpop.f32.mrb[6].mxu0 }
 0x428   :  { %v1504_v49 = vpop.f32.mrb[7].mxu0  ;;  %v689_v50 = vpop.f32.mrb[6].mxu1  ;;  %v700_v56 = vrot.slane %v618_v48, 2 }
 0x429   :  { %v693_v51 = vmax.f32 %v689_v50, 1e-16  ;;  %v1509_v52 = vpop.f32.mrb[7].mxu1 }
 0x42b   :  { %1584 = vrsqrt.f32 %v693_v51 }
 0x435   :  { %v1585_v53 = vpop.eup %1584 }
 0x436   :  { %v695_v54 = vmul.f32 %v1585_v53, %v618_v48 }
 0x438   :  { %v696_v55 = vmul.f32 1.442695, %v695_v54 }
 0x43a   :  { %1586 = vpow2.f32 %v696_v55 }
 0x444   :  { %v1587_v57 = vpop.eup %1586 }
 0x445   :  { %v698_v58 = vadd.f32 %v1587_v57, %v541_v43  ;;  %v702_v59 = vmul.f32 %v1587_v57, %v700_v56 }
 0x447   :  { %v703_v60 = vadd.f32 %v702_v59, %v546_v45 }
 0x448   :  { %1728 = dma.done.wait [#allocation3 + $0x4], 128 }
 0x449   :  { %1729 = vsyncadd [#allocation3 + $0x4], 4294967168  ;;  %1515 = vmatprep.subr.mxu1 %v1750_v2  ;;  %1517 = vmatprep.mubr.msk.f32.mxu1 %vm1751_vm0, %v1750_v2  ;;  %v708_v61 = vld [vmem:[#allocation2 + $0x20] sm:$0xff] }
 0x44a   :  { %1510 = vmatprep.subr.mxu0 %v1750_v2  ;;  %1512 = vmatprep.mubr.msk.f32.mxu0 %vm1751_vm0, %v1750_v2  ;;  %v779_v62 = vmul.f32 %v708_v61, %v708_v61 }
 0x44b   :  { %1511 = vmatpush3.xpose.msra.mxu0 %v708_v61 }
 0x44c   :  { %1516 = vmatpush3.xpose.msra.mxu1 %v779_v62 }
 0x44e   :  { %1513 = vmatmul.mubr.f32.vlgmr.msra.gmra.mrb[8].mxu0 %v1844_v0 }
 0x44f   :  { %1518 = vmatmul.mubr.f32.vlgmr.msra.gmra.mrb[8].mxu1 %v1846_v1 }
 0x521   :  { %v775_v63 = vpop.f32.mrb[8].mxu0 }
 0x522   :  { %v1514_v3 = vpop.f32.mrb[9].mxu0  ;;  %v846_v4 = vpop.f32.mrb[8].mxu1  ;;  %v857_v10 = vrot.slane %v775_v63, 2 }
 0x523   :  { %v850_v5 = vmax.f32 %v846_v4, 1e-16  ;;  %v1519_v6 = vpop.f32.mrb[9].mxu1 }
 0x525   :  { %1588 = vrsqrt.f32 %v850_v5 }
 0x52f   :  { %v1589_v7 = vpop.eup %1588 }
 0x530   :  { %v852_v8 = vmul.f32 %v1589_v7, %v775_v63 }
 0x532   :  { %v853_v9 = vmul.f32 1.442695, %v852_v8 }
 0x534   :  { %1590 = vpow2.f32 %v853_v9 }
 0x53e   :  { %v1591_v11 = vpop.eup %1590 }
 0x53f   :  { %v855_v12 = vadd.f32 %v1591_v11, %v698_v58  ;;  %v859_v13 = vmul.f32 %v1591_v11, %v857_v10 }
 0x541   :  { %v860_v14 = vadd.f32 %v859_v13, %v703_v60 }
 0x542   :  { %1730 = dma.done.wait [#allocation3 + $0x5], 128 }
 0x543   :  { %1731 = vsyncadd [#allocation3 + $0x5], 4294967168  ;;  %1525 = vmatprep.subr.mxu1 %v1750_v2  ;;  %1527 = vmatprep.mubr.msk.f32.mxu1 %vm1751_vm0, %v1750_v2  ;;  %v865_v15 = vld [vmem:[#allocation2 + $0x28] sm:$0xff] }
 0x544   :  { %1520 = vmatprep.subr.mxu0 %v1750_v2  ;;  %1522 = vmatprep.mubr.msk.f32.mxu0 %vm1751_vm0, %v1750_v2  ;;  %v936_v16 = vmul.f32 %v865_v15, %v865_v15 }
 0x545   :  { %1521 = vmatpush3.xpose.msra.mxu0 %v865_v15 }
 0x546   :  { %1526 = vmatpush3.xpose.msra.mxu1 %v936_v16 }
 0x548   :  { %1523 = vmatmul.mubr.f32.vlgmr.msra.gmra.mrb[10].mxu0 %v1844_v0 }
 0x549   :  { %1528 = vmatmul.mubr.f32.vlgmr.msra.gmra.mrb[10].mxu1 %v1846_v1 }
 0x61b   :  { %v932_v17 = vpop.f32.mrb[10].mxu0 }
 0x61c   :  { %v1524_v18 = vpop.f32.mrb[11].mxu0  ;;  %v1003_v19 = vpop.f32.mrb[10].mxu1  ;;  %v1014_v25 = vrot.slane %v932_v17, 2 }
 0x61d   :  { %v1007_v20 = vmax.f32 %v1003_v19, 1e-16  ;;  %v1529_v21 = vpop.f32.mrb[11].mxu1 }
 0x61f   :  { %1592 = vrsqrt.f32 %v1007_v20 }
 0x629   :  { %v1593_v22 = vpop.eup %1592 }
 0x62a   :  { %v1009_v23 = vmul.f32 %v1593_v22, %v932_v17 }
 0x62c   :  { %v1010_v24 = vmul.f32 1.442695, %v1009_v23 }
 0x62e   :  { %1594 = vpow2.f32 %v1010_v24 }
 0x638   :  { %v1595_v26 = vpop.eup %1594 }
 0x639   :  { %v1012_v27 = vadd.f32 %v1595_v26, %v855_v12  ;;  %v1016_v28 = vmul.f32 %v1595_v26, %v1014_v25 }
 0x63b   :  { %v1017_v29 = vadd.f32 %v1016_v28, %v860_v14 }
 0x63c   :  { %1732 = dma.done.wait [#allocation3 + $0x6], 128 }
 0x63d   :  { %1733 = vsyncadd [#allocation3 + $0x6], 4294967168  ;;  %1535 = vmatprep.subr.mxu1 %v1750_v2  ;;  %1537 = vmatprep.mubr.msk.f32.mxu1 %vm1751_vm0, %v1750_v2  ;;  %v1022_v30 = vld [vmem:[#allocation2 + $0x30] sm:$0xff] }
 0x63e   :  { %1530 = vmatprep.subr.mxu0 %v1750_v2  ;;  %1532 = vmatprep.mubr.msk.f32.mxu0 %vm1751_vm0, %v1750_v2  ;;  %v1093_v31 = vmul.f32 %v1022_v30, %v1022_v30 }
 0x63f   :  { %1531 = vmatpush3.xpose.msra.mxu0 %v1022_v30 }
 0x640   :  { %1536 = vmatpush3.xpose.msra.mxu1 %v1093_v31 }
 0x642   :  { %1533 = vmatmul.mubr.f32.vlgmr.msra.gmra.mrb[12].mxu0 %v1844_v0 }
 0x643   :  { %1538 = vmatmul.mubr.f32.vlgmr.msra.gmra.mrb[12].mxu1 %v1846_v1 }
 0x715   :  { %v1089_v32 = vpop.f32.mrb[12].mxu0 }
 0x716   :  { %v1534_v33 = vpop.f32.mrb[13].mxu0  ;;  %v1160_v34 = vpop.f32.mrb[12].mxu1  ;;  %v1171_v40 = vrot.slane %v1089_v32, 2 }
 0x717   :  { %v1164_v35 = vmax.f32 %v1160_v34, 1e-16  ;;  %v1539_v36 = vpop.f32.mrb[13].mxu1 }
 0x719   :  { %1596 = vrsqrt.f32 %v1164_v35 }
 0x723   :  { %v1597_v37 = vpop.eup %1596 }
 0x724   :  { %v1166_v38 = vmul.f32 %v1597_v37, %v1089_v32 }
 0x726   :  { %v1167_v39 = vmul.f32 1.442695, %v1166_v38 }
 0x728   :  { %1598 = vpow2.f32 %v1167_v39 }
 0x732   :  { %v1599_v41 = vpop.eup %1598 }
 0x733   :  { %v1169_v42 = vadd.f32 %v1599_v41, %v1012_v27  ;;  %v1173_v43 = vmul.f32 %v1599_v41, %v1171_v40 }
 0x735   :  { %v1174_v44 = vadd.f32 %v1173_v43, %v1017_v29 }
 0x736   :  { %1734 = dma.done.wait [#allocation3 + $0x7], 128 }
 0x737   :  { %1735 = vsyncadd [#allocation3 + $0x7], 4294967168  ;;  %1545 = vmatprep.subr.mxu1 %v1750_v2  ;;  %1547 = vmatprep.mubr.msk.f32.mxu1 %vm1751_vm0, %v1750_v2  ;;  %v1179_v45 = vld [vmem:[#allocation2 + $0x38] sm:$0xff]  ;;  %s1752_s3 = smov [#allocation11]   ;;  %vm1339_vm1 = vcmask 57344  }
 0x738   :  { %1540 = vmatprep.subr.mxu0 %v1750_v2  ;;  %1542 = vmatprep.mubr.msk.f32.mxu0 %vm1751_vm0, %v1750_v2  ;;  %v1250_v46 = vmul.f32 %v1179_v45, %v1179_v45  ;;  %s1347_s15 = sshll.u32 %s1752_s3, 4  ;;  %s1348_s15 = int_to_ptr.vmem [resolvable:$true] %s1347_s15 }
 0x739   :  { %1541 = vmatpush3.xpose.msra.mxu0 %v1179_v45  ;;  %s1684_s16 = scalar_lea.vmem %s1348_s15, 16  ;;  %s1688_s17 = scalar_lea.vmem %s1348_s15, 32 }
 0x73a   :  { %1546 = vmatpush3.xpose.msra.mxu1 %v1250_v46  ;;  %p1685_p5 = scmp.ne.s32.totalorder %s1348_s15, %s1684_s16  ;;  %p1689_p6 = scmp.lt.s32.totalorder %s1348_s15, %s1348_s15 }
 0x73b   :  { %p1690_p7 = scmp.lt.s32.totalorder %s1688_s17, %s1684_s16 }
 0x73c   :  { %1543 = vmatmul.mubr.f32.vlgmr.msra.gmra.mrb[14].mxu0 %v1844_v0 }
 0x73d   :  { %1548 = vmatmul.mubr.f32.vlgmr.msra.gmra.mrb[14].mxu1 %v1846_v1  ;;  %p1691_p8 = por %p1690_p7, %p1689_p6 }
 0x73f   :  { %p1692_p9 = pnand %p1691_p8, %p1685_p5 }
 0x80f   :  { %v1246_v47 = vpop.f32.mrb[14].mxu0 }
 0x810   :  { %v1544_v48 = vpop.f32.mrb[15].mxu0  ;;  %v1317_v49 = vpop.f32.mrb[14].mxu1  ;;  %v1328_v55 = vrot.slane %v1246_v47, 2 }
 0x811   :  { %v1321_v50 = vmax.f32 %v1317_v49, 1e-16  ;;  %v1549_v51 = vpop.f32.mrb[15].mxu1 }
 0x813   :  { %1600 = vrsqrt.f32 %v1321_v50 }
 0x81d   :  { %v1601_v52 = vpop.eup %1600 }
 0x81e   :  { %v1323_v53 = vmul.f32 %v1601_v52, %v1246_v47 }
 0x820   :  { %v1324_v54 = vmul.f32 1.442695, %v1323_v53 }
 0x822   :  { %1602 = vpow2.f32 %v1324_v54 }
 0x82c   :  { %v1603_v2 = vpop.eup %1602 }
 0x82d   :  { %v1326_v56 = vadd.f32 %v1603_v2, %v1169_v42  ;;  %v1330_v57 = vmul.f32 %v1603_v2, %v1328_v55 }
 0x82f   :  { %v1332_v58 = vmax.f32 %v1326_v56, 1e-12  ;;  %v1331_v59 = vadd.f32 %v1330_v57, %v1174_v44 }
 0x831   :  { %1604 = vrcp.f32 %v1332_v58 }
 0x83b   :  { %v1605_v0 = vpop.eup %1604 }
 0x83c   :  { %v1334_v60 = vmul.f32 %v1605_v0, %v1331_v59 }
 0x83e   :  { %v1336_v1 = vrot.slane %v1334_v60, 1 }
 0x840   :  { %v1338_v61 = vadd.f32 %v1336_v1, %v1334_v60 }
 0x842   :  { %1340 = vst.msk [vmem:[#allocation11] sm:$0x1] %vm1339_vm1, %v1338_v61 }
 0x843   :  { %1695 = shalt.err (!%p1692_p9)
}
 0x844   :  { %s1696_s1 = scalar_lea.hbm %s1928_s4, 16 }
 0x845   :  { %p1697_p10 = scmp.ne.s32.totalorder %s1928_s4, %s1696_s1  ;;  %p1700_p11 = scmp.lt.u32.totalorder %s1696_s1, %s1928_s4 }
 0x847   :  { %p1702_p12 = pnand %p1700_p11, %p1697_p10 }
 0x849   :  { %1705 = shalt.err (!%p1702_p12)
}
 0x84a   :  { %1350 = dma.vmem_to_hbm [thread:$0]  %s1348_s15, 16, %s1928_s4, [#allocation8]  }
 0x84b   :  { %1736 = dma.done.wait [#allocation8], 16  }
 0x84c   :  { %1737 = vsyncadd [#allocation8], 4294967280 }
 0x84d   :  { %1354 = vsyncpa [#allocation7], 1 }
 0x84e   :  { %1355 = vsyncpa [#allocation10], 1 }
 0x84f   :  { %1356 = vsyncpa [#allocation8], 1 }
 0x850   :  { %1357 = vsyncmov [#allocation3] }
 0x853   :  { %s1358_s25 = vpop.sfrf %1357 }
 0x854   :  { %p1430_p13 = scmp.ne.s32.totalorder %s1358_s25, 0 }
 0x856   :  { %1362 = shalt.err (%p1430_p13)  }
 0x857   :  { %1364 = vsyncmov [#allocation3 + $0x1] }
 0x85a   :  { %s1365_s26 = vpop.sfrf %1364 }
 0x85b   :  { %p1431_p0 = scmp.ne.s32.totalorder %s1365_s26, 0 }
 0x85d   :  { %1369 = shalt.err (%p1431_p0)  }
 0x85e   :  { %1371 = vsyncmov [#allocation3 + $0x2] }
 0x861   :  { %s1372_s27 = vpop.sfrf %1371 }
 0x862   :  { %p1432_p1 = scmp.ne.s32.totalorder %s1372_s27, 0 }
 0x864   :  { %1376 = shalt.err (%p1432_p1)  }
 0x865   :  { %1378 = vsyncmov [#allocation3 + $0x3] }
 0x868   :  { %s1379_s28 = vpop.sfrf %1378 }
 0x869   :  { %p1433_p2 = scmp.ne.s32.totalorder %s1379_s28, 0 }
 0x86b   :  { %1383 = shalt.err (%p1433_p2)  }
 0x86c   :  { %1385 = vsyncmov [#allocation3 + $0x4] }
 0x86f   :  { %s1386_s4 = vpop.sfrf %1385 }
 0x870   :  { %p1434_p3 = scmp.ne.s32.totalorder %s1386_s4, 0 }
 0x872   :  { %1390 = shalt.err (%p1434_p3)  }
 0x873   :  { %1392 = vsyncmov [#allocation3 + $0x5] }
 0x876   :  { %s1393_s29 = vpop.sfrf %1392 }
 0x877   :  { %p1435_p4 = scmp.ne.s32.totalorder %s1393_s29, 0 }
 0x879   :  { %1397 = shalt.err (%p1435_p4)  }
 0x87a   :  { %1399 = vsyncmov [#allocation3 + $0x6] }
 0x87d   :  { %s1400_s30 = vpop.sfrf %1399 }
 0x87e   :  { %p1436_p5 = scmp.ne.s32.totalorder %s1400_s30, 0 }
 0x880   :  { %1404 = shalt.err (%p1436_p5)  }
 0x881   :  { %1406 = vsyncmov [#allocation3 + $0x7] }
 0x884   :  { %s1407_s5 = vpop.sfrf %1406 }
 0x885   :  { %p1437_p6 = scmp.ne.s32.totalorder %s1407_s5, 0 }
 0x887   :  { %1411 = shalt.err (%p1437_p6)  }

</bundles_post_ra>
